<compile_context>
chip_gen: v7x
topology: tpu7x:2x2x1
jax: 0.10.0
libtpu: 0.0.40
codegen_flags: <defaults>
</compile_context>

<pallas_src>
import jax
import jax.numpy as jnp
from jax import lax
from jax.experimental import pallas as pl
from jax.experimental.pallas import tpu as pltpu


_NEG_BIG = -1e30  # finite "-inf" for padded vocab columns (bf16/f32 safe)


def _round_up(x, m):
    return (x + m - 1) // m * m


def _pick_vocab_tile(v_pad, tv):
    """Largest multiple of 128 that divides v_pad and is <= max(tv, 128)."""
    if v_pad % 128 != 0:
        return None
    t = min(max(128, (tv // 128) * 128), v_pad)
    while t >= 128:
        if v_pad % t == 0:
            return t
        t -= 128
    return None


def _vmem_limit_bytes():
    """~75% of per-TensorCore VMEM: 48 MiB on v7x, 96 MiB on v5e/v6e."""
    cap = 128 * 2**20                       # v4 / v5e / v6e physical VMEM
    try:
        kind = jax.devices()[0].device_kind.lower()
        if "v7" in kind:
            cap = 64 * 2**20                # v7x: 64 MiB per TensorCore
    except Exception:
        pass
    try:
        info_cap = int(pltpu.get_tpu_info().vmem_capacity_bytes)
        if info_cap > 0:
            cap = min(cap, info_cap)
    except Exception:
        pass
    return (cap * 3) // 4


def _vmem_estimate(tm, tv, d, x_item, w_item):
    return (2 * tm * d * x_item             # x tile (double buffered)
            + 2 * d * tv * w_item           # W^T tile (double buffered)
            + 2 * tv * 4                    # bias tile
            + 8 * tm * 4                    # target + per-row-loss tiles
            + 3 * tm * 128 * 4              # (tm, 1) scratch, lane-padded
            + 4 * tm * tv * 4)              # logits / exp temporaries


def _mlm_kernel(x_ref, w_ref, b_ref, tgt_ref, out_ref, m_ref, l_ref, tl_ref):
    """Online-logsumexp cross-entropy over one (row tile, vocab tile)."""
    j = pl.program_id(1)
    tv = w_ref.shape[1]

    @pl.when(j == 0)
    def _():
        m_ref[...] = jnp.full(m_ref.shape, -jnp.inf, dtype=jnp.float32)
        l_ref[...] = jnp.zeros(l_ref.shape, dtype=jnp.float32)
        tl_ref[...] = jnp.zeros(tl_ref.shape, dtype=jnp.float32)

    # bf16 operands straight to the MXU, f32 accumulation.
    logits = jnp.dot(x_ref[...], w_ref[...],
                     preferred_element_type=jnp.float32)
    logits = logits + b_ref[...].astype(jnp.float32)            # (tm, tv)

    # Online logsumexp update.
    m_prev = m_ref[...]                                          # (tm, 1)
    m_new = jnp.maximum(m_prev, jnp.max(logits, axis=-1, keepdims=True))
    alpha = jnp.exp(m_prev - m_new)
    p = jnp.exp(logits - m_new)
    l_ref[...] = alpha * l_ref[...] + jnp.sum(p, axis=-1, keepdims=True)
    m_ref[...] = m_new

    # Target logit: compare the LOCAL column iota against (tgt - j*tv)
    # instead of offsetting the whole (tm, tv) iota (saves one full-tile
    # VPU add per vocab step).  Rows with ignore_index never match.
    tgt_local = tgt_ref[...] - j * tv                            # (tm, 1)
    col = lax.broadcasted_iota(jnp.int32, logits.shape, 1)
    tl_ref[...] += jnp.sum(jnp.where(col == tgt_local, logits, 0.0),
                           axis=-1, keepdims=True)

    @pl.when(j == pl.num_programs(1) - 1)
    def _():
        # per-row loss = logsumexp(logits) - logits[target]
        out_ref[...] = m_ref[...] + jnp.log(l_ref[...]) - tl_ref[...]


def prepare_masked_lm_params(weight, bias, *, tv=512,
                             param_dtype=jnp.bfloat16):
    """One-time parameter prep (do when the params are stored, NOT per call):
      * transpose nn.Linear weight (V, D) -> (D, V)
      * pad the vocab dim to a multiple of the vocab tile (zero weight
        columns, -1e30 bias so padded columns never win the logsumexp)
      * cast the weight to bf16 for the MXU (bias stays f32).
    Returns (weight_t, bias_row) ready for masked_lm_loss."""
    weight = jnp.asarray(weight)
    V, D = weight.shape
    tv_eff = _round_up(max(128, min(tv, _round_up(V, 128))), 128)
    v_pad = _round_up(V, tv_eff)
    w_t = weight.T.astype(param_dtype)
    bias_row = jnp.asarray(bias, jnp.float32).reshape(1, V)
    if v_pad != V:
        w_t = jnp.pad(w_t, ((0, 0), (0, v_pad - V)))
        bias_row = jnp.pad(bias_row, ((0, 0), (0, v_pad - V)),
                           constant_values=_NEG_BIG)
    return w_t, bias_row


def masked_lm_loss(x, origin_tokens, weight_t, bias_row, *, tm=1024, tv=512,
                   ignore_index=-100, w_buffers=2):
    """
    x:             (batch, seq, D) float (f32 or bf16)
    origin_tokens: (batch, seq)    int   (PyTorch ignore_index=-100 honored)
    weight_t:      (D, V_pad)      from prepare_masked_lm_params (bf16)
    bias_row:      (1, V_pad)      from prepare_masked_lm_params (f32)
    tm, tv:        row / vocab tile sizes (tm>=512 recommended so the W^T
                   stream has MXU-roofline reuse; keep multiples of 128)
    w_buffers:     >2 requests deeper W^T pipelining (v6e, if VMEM headroom)
    Returns the scalar f32 cross-entropy loss (mean over non-ignored rows).
    """
    B, S, D = x.shape
    Dw, v_pad = weight_t.shape
    assert Dw == D, (Dw, D)
    N = B * S

    bias_row = jnp.asarray(bias_row, jnp.float32).reshape(1, -1)
    assert bias_row.shape[1] == v_pad, (bias_row.shape, v_pad)

    tv_eff = _pick_vocab_tile(v_pad, tv)
    if tv_eff is None:
        # Slow path (per-call HBM copy of W): prefer padding once via
        # prepare_masked_lm_params.
        tv_eff = _round_up(max(128, min(tv, _round_up(v_pad, 128))), 128)
        new_v = _round_up(v_pad, tv_eff)
        weight_t = jnp.pad(weight_t, ((0, 0), (0, new_v - v_pad)))
        bias_row = jnp.pad(bias_row, ((0, 0), (0, new_v - v_pad)),
                           constant_values=_NEG_BIG)
        v_pad = new_v

    # bf16 operands for the MXU (accumulation stays f32 inside the dot).
    x2 = x.reshape(N, D)
    if x2.dtype != weight_t.dtype:
        x2 = x2.astype(weight_t.dtype)
    tgt = origin_tokens.reshape(N).astype(jnp.int32)
    tgt2 = tgt.reshape(N, 1)

    # Row tile: multiple of 8, clamped for tiny inputs, shrunk if the VMEM
    # estimate would exceed the generation-aware limit.
    tm_eff = _round_up(min(tm, _round_up(N, 8)), 8)
    vmem_limit = _vmem_limit_bytes()
    x_item = x2.dtype.itemsize
    w_item = weight_t.dtype.itemsize
    while (tm_eff > 256
           and _vmem_estimate(tm_eff, tv_eff, D, x_item, w_item)
               > (vmem_limit * 85) // 100):
        tm_eff = max(256, _round_up(tm_eff // 2, 8))

    n_row_tiles = pl.cdiv(N, tm_eff)
    grid = (n_row_tiles, v_pad // tv_eff)

    w_spec = pl.BlockSpec((D, tv_eff), lambda i, j: (0, j))
    if w_buffers > 2 and grid[1] > 2:
        # Deeper W^T pipelining (perf-review suggestion for v6e headroom).
        w_spec = pl.BlockSpec((D, tv_eff), lambda i, j: (0, j),
                              pipeline_mode=pl.Buffered(w_buffers))

    cost = pl.CostEstimate(
        flops=2 * N * D * v_pad,
        transcendentals=N * v_pad,
        bytes_accessed=int(N * D * x_item
                           + n_row_tiles * (D * v_pad * w_item + v_pad * 4)
                           + N * 4            # targets
                           + N * 4))          # per-row losses

    per_row = pl.pallas_call(
        _mlm_kernel,
        out_shape=jax.ShapeDtypeStruct((N, 1), jnp.float32),
        grid_spec=pltpu.PrefetchScalarGridSpec(
            num_scalar_prefetch=0,
            grid=grid,
            in_specs=[
                pl.BlockSpec((tm_eff, D), lambda i, j: (i, 0)),     # x rows
                w_spec,                                             # W^T tile
                pl.BlockSpec((1, tv_eff), lambda i, j: (0, j)),     # bias tile
                pl.BlockSpec((tm_eff, 1), lambda i, j: (i, 0)),     # targets
            ],
            out_specs=pl.BlockSpec((tm_eff, 1), lambda i, j: (i, 0)),
            scratch_shapes=[pltpu.VMEM((tm_eff, 1), jnp.float32)] * 3,
        ),
        compiler_params=pltpu.CompilerParams(
            # Row axis "parallel" -> megacore/TC split on multi-core chips.
            dimension_semantics=("parallel", "arbitrary"),
            vmem_limit_bytes=int(vmem_limit)),
        cost_estimate=cost,
    )(x2, weight_t, bias_row, tgt2)

    # Mean + ignore_index masking outside the kernel (no serial scalar
    # accumulator in the grid loop).  All-ignored batches return 0.0 here,
    # whereas PyTorch returns NaN.
    per_row = per_row[:, 0]
    valid = tgt != ignore_index
    count = jnp.maximum(jnp.sum(valid.astype(jnp.float32)), 1.0)
    return jnp.sum(jnp.where(valid, per_row, 0.0)) / count


def _reference_loss(x, origin_tokens, weight, bias, ignore_index=-100):
    B, S, D = x.shape
    V = weight.shape[0]
    logits = (x.reshape(-1, D).astype(jnp.float32)
              @ weight.T.astype(jnp.float32)) + bias.astype(jnp.float32)[None, :]
    tgt = origin_tokens.reshape(-1)
    lse = jax.scipy.special.logsumexp(logits, axis=-1)
    safe_tgt = jnp.clip(tgt, 0, V - 1)
    tl = jnp.take_along_axis(logits, safe_tgt[:, None], axis=-1)[:, 0]
    per_row = lse - tl
    valid = tgt != ignore_index
    cnt = jnp.maximum(jnp.sum(valid.astype(jnp.float32)), 1.0)
    return jnp.sum(jnp.where(valid, per_row, 0.0)) / cnt


if __name__ == "__main__":
    key = jax.random.PRNGKey(0)
    k = jax.random.split(key, 8)

    # ---- Test 1: shapes implied by the module (small) --------------------
    batch, seq, D, V = 2, 8, 32, 128
    x = jax.random.normal(k[0], (batch, seq, D), dtype=jnp.float32)
    origin_tokens = jax.random.randint(k[1], (batch, seq), 0, V, dtype=jnp.int32)
    bound = 1.0 / (D ** 0.5)
    weight = jax.random.uniform(k[2], (V, D), jnp.float32, -bound, bound)
    bias = jax.random.uniform(k[3], (V,), jnp.float32, -bound, bound)

    w_t, b_row = prepare_masked_lm_params(weight, bias)   # one-time param prep
    loss = jax.block_until_ready(masked_lm_loss(x, origin_tokens, w_t, b_row))
    ref = _reference_loss(x, origin_tokens, weight, bias)
    assert jnp.allclose(loss, ref, rtol=2e-2, atol=2e-2), (loss, ref)

    # ---- Test 2: row + vocab tiling, partial row tile, ignore_index -------
    batch2, seq2, D2, V2 = 4, 96, 64, 1000
    x_b = jax.random.normal(k[4], (batch2, seq2, D2), dtype=jnp.float32)
    tok_b = jax.random.randint(k[5], (batch2, seq2), 0, V2, dtype=jnp.int32)
    # Exercise PyTorch CrossEntropyLoss default ignore_index=-100.
    mask = jax.random.bernoulli(k[6], 0.25, (batch2, seq2))
    tok_b = jnp.where(mask, jnp.int32(-100), tok_b)
    bound2 = 1.0 / (D2 ** 0.5)
    w_b = jax.random.uniform(k[7], (V2, D2), jnp.float32, -bound2, bound2)
    b_b = jnp.zeros((V2,), jnp.float32)

    w_t2, b_row2 = prepare_masked_lm_params(w_b, b_b)      # V=1000 -> pad 1024
    # tm=256 forces 2 row tiles (the second one partial) + 2 vocab tiles.
    loss2 = jax.block_until_ready(
        masked_lm_loss(x_b, tok_b, w_t2, b_row2, tm=256))
    ref2 = _reference_loss(x_b, tok_b, w_b, b_b)
    assert jnp.allclose(loss2, ref2, rtol=2e-2, atol=2e-2), (loss2, ref2)

    print("KERNEL_OK")
</pallas_src>

<mosaic_0001>
module attributes {stable_mosaic.version = 11 : i64} {
  func.func @_mlm_kernel(%arg0: i32, %arg1: i32, %arg2: memref<16x32xbf16, #tpu.memory_space<vmem>>, %arg3: memref<32x128xbf16, #tpu.memory_space<vmem>>, %arg4: memref<1x128xf32, #tpu.memory_space<vmem>>, %arg5: memref<16x1xi32, #tpu.memory_space<vmem>>, %arg6: memref<16x1xf32, #tpu.memory_space<vmem>>, %arg7: memref<16x1xf32, #tpu.memory_space<vmem>>, %arg8: memref<16x1xf32, #tpu.memory_space<vmem>>, %arg9: memref<16x1xf32, #tpu.memory_space<vmem>>) attributes {dimension_semantics = [#tpu.dimension_semantics<parallel>, #tpu.dimension_semantics<arbitrary>], iteration_bounds = array<i64: 1, 1>, scalar_prefetch = 0 : i64, scratch_operands = 3 : i64, tpu.core_type = #tpu.core_type<tc>, window_params = [{transform_indices = @transform_0, window_bounds = array<i64: 16, 32>}, {transform_indices = @transform_1, window_bounds = array<i64: 32, 128>}, {transform_indices = @transform_2, window_bounds = array<i64: 1, 128>}, {transform_indices = @transform_3, window_bounds = array<i64: 16, 1>}, {transform_indices = @transform_4, window_bounds = array<i64: 16, 1>}]} {
    %c0_i32 = arith.constant 0 : i32
    %0 = arith.cmpi eq, %arg1, %c0_i32 : i32
    %1 = arith.extui %0 : i1 to i32
    %c0_i32_0 = arith.constant 0 : i32
    %2 = arith.cmpi ne, %1, %c0_i32_0 : i32
    scf.if %2 {
      %cst_26 = arith.constant 0xFF800000 : f32
      %42 = vector.broadcast %cst_26 : f32 to vector<16x1xf32>
      %c0_27 = arith.constant 0 : index
      %c0_28 = arith.constant 0 : index
      %43 = vector.load %arg7[%c0_27, %c0_28] : memref<16x1xf32, #tpu.memory_space<vmem>>, vector<16x1xf32>
      tpu.vector_store %arg7[%c0_27, %c0_28], %42 {strides = array<i32>} : memref<16x1xf32, #tpu.memory_space<vmem>>, vector<16x1xf32>,
      %cst_29 = arith.constant 0.000000e+00 : f32
      %44 = vector.broadcast %cst_29 : f32 to vector<16x1xf32>
      %c0_30 = arith.constant 0 : index
      %c0_31 = arith.constant 0 : index
      %45 = vector.load %arg8[%c0_30, %c0_31] : memref<16x1xf32, #tpu.memory_space<vmem>>, vector<16x1xf32>
      tpu.vector_store %arg8[%c0_30, %c0_31], %44 {strides = array<i32>} : memref<16x1xf32, #tpu.memory_space<vmem>>, vector<16x1xf32>,
      %cst_32 = arith.constant 0.000000e+00 : f32
      %46 = vector.broadcast %cst_32 : f32 to vector<16x1xf32>
      %c0_33 = arith.constant 0 : index
      %c0_34 = arith.constant 0 : index
      %47 = vector.load %arg9[%c0_33, %c0_34] : memref<16x1xf32, #tpu.memory_space<vmem>>, vector<16x1xf32>
      tpu.vector_store %arg9[%c0_33, %c0_34], %46 {strides = array<i32>} : memref<16x1xf32, #tpu.memory_space<vmem>>, vector<16x1xf32>,
    } else {
    }
    %c0 = arith.constant 0 : index
    %c0_1 = arith.constant 0 : index
    %3 = vector.load %arg2[%c0, %c0_1] : memref<16x32xbf16, #tpu.memory_space<vmem>>, vector<16x32xbf16>
    %c0_2 = arith.constant 0 : index
    %c0_3 = arith.constant 0 : index
    %4 = vector.load %arg3[%c0_2, %c0_3] : memref<32x128xbf16, #tpu.memory_space<vmem>>, vector<32x128xbf16>
    %cst = arith.constant dense<0.000000e+00> : vector<16x128xf32>
    %5 = tpu.matmul %3, %4, %cst {dimension_numbers = #tpu.dot_dimension_numbers<[1], [0], [0], [1], [0, 0, 1, 1], [], []>} : vector<16x32xbf16>, vector<32x128xbf16>, vector<16x128xf32> -> vector<16x128xf32>
    %c0_4 = arith.constant 0 : index
    %c0_5 = arith.constant 0 : index
    %6 = vector.load %arg4[%c0_4, %c0_5] : memref<1x128xf32, #tpu.memory_space<vmem>>, vector<1x128xf32>
    %7 = vector.broadcast %6 : vector<1x128xf32> to vector<16x128xf32>
    %8 = arith.addf %5, %7 : vector<16x128xf32>
    %c0_6 = arith.constant 0 : index
    %c0_7 = arith.constant 0 : index
    %9 = vector.load %arg7[%c0_6, %c0_7] : memref<16x1xf32, #tpu.memory_space<vmem>>, vector<16x1xf32>
    %cst_8 = arith.constant dense<0xFF800000> : vector<16xf32>
    %10 = vector.multi_reduction <maximumf>, %8, %cst_8 [1] : vector<16x128xf32> to vector<16xf32>
    %11 = vector.shape_cast %10 : vector<16xf32> to vector<16x1xf32>
    %12 = arith.maximumf %9, %11 : vector<16x1xf32>
    %13 = arith.subf %9, %12 : vector<16x1xf32>
    %14 = math.exp %13 : vector<16x1xf32>
    %15 = vector.broadcast %12 : vector<16x1xf32> to vector<16x128xf32>
    %16 = arith.subf %8, %15 : vector<16x128xf32>
    %17 = math.exp %16 : vector<16x128xf32>
    %c0_9 = arith.constant 0 : index
    %c0_10 = arith.constant 0 : index
    %18 = vector.load %arg8[%c0_9, %c0_10] : memref<16x1xf32, #tpu.memory_space<vmem>>, vector<16x1xf32>
    %19 = arith.mulf %14, %18 : vector<16x1xf32>
    %cst_11 = arith.constant dense<0.000000e+00> : vector<16xf32>
    %20 = vector.multi_reduction <add>, %17, %cst_11 [1] : vector<16x128xf32> to vector<16xf32>
    %21 = vector.shape_cast %20 : vector<16xf32> to vector<16x1xf32>
    %22 = arith.addf %19, %21 : vector<16x1xf32>
    %c0_12 = arith.constant 0 : index
    %c0_13 = arith.constant 0 : index
    %23 = vector.load %arg8[%c0_12, %c0_13] : memref<16x1xf32, #tpu.memory_space<vmem>>, vector<16x1xf32>
    tpu.vector_store %arg8[%c0_12, %c0_13], %22 {strides = array<i32>} : memref<16x1xf32, #tpu.memory_space<vmem>>, vector<16x1xf32>,
    %c0_14 = arith.constant 0 : index
    %c0_15 = arith.constant 0 : index
    %24 = vector.load %arg7[%c0_14, %c0_15] : memref<16x1xf32, #tpu.memory_space<vmem>>, vector<16x1xf32>
    tpu.vector_store %arg7[%c0_14, %c0_15], %12 {strides = array<i32>} : memref<16x1xf32, #tpu.memory_space<vmem>>, vector<16x1xf32>,
    %c0_16 = arith.constant 0 : index
    %c0_17 = arith.constant 0 : index
    %25 = vector.load %arg5[%c0_16, %c0_17] : memref<16x1xi32, #tpu.memory_space<vmem>>, vector<16x1xi32>
    %c128_i32 = arith.constant 128 : i32
    %26 = arith.muli %arg1, %c128_i32 : i32
    %27 = vector.broadcast %26 : i32 to vector<16x1xi32>
    %28 = arith.subi %25, %27 : vector<16x1xi32>
    %29 = tpu.iota {dimensions = array<i32: 1>} : vector<16x128xi32>
    %c0_18 = arith.constant 0 : index
    %c0_19 = arith.constant 0 : index
    %30 = vector.load %arg9[%c0_18, %c0_19] : memref<16x1xf32, #tpu.memory_space<vmem>>, vector<16x1xf32>
    %31 = vector.broadcast %28 : vector<16x1xi32> to vector<16x128xi32>
    %32 = arith.cmpi eq, %29, %31 : vector<16x128xi32>
    %cst_20 = arith.constant 0.000000e+00 : f32
    %33 = vector.broadcast %cst_20 : f32 to vector<16x128xf32>
    %34 = arith.select %32, %8, %33 : vector<16x128xi1>, vector<16x128xf32>
    %cst_21 = arith.constant dense<0.000000e+00> : vector<16xf32>
    %35 = vector.multi_reduction <add>, %34, %cst_21 [1] : vector<16x128xf32> to vector<16xf32>
    %36 = vector.shape_cast %35 : vector<16xf32> to vector<16x1xf32>
    %37 = arith.addf %30, %36 : vector<16x1xf32>
    %c0_22 = arith.constant 0 : index
    %c0_23 = arith.constant 0 : index
    %38 = vector.load %arg9[%c0_22, %c0_23] : memref<16x1xf32, #tpu.memory_space<vmem>>, vector<16x1xf32>
    tpu.vector_store %arg9[%c0_22, %c0_23], %37 {strides = array<i32>} : memref<16x1xf32, #tpu.memory_space<vmem>>, vector<16x1xf32>,
    %c0_i32_24 = arith.constant 0 : i32
    %39 = arith.cmpi eq, %arg1, %c0_i32_24 : i32
    %40 = arith.extui %39 : i1 to i32
    %c0_i32_25 = arith.constant 0 : i32
    %41 = arith.cmpi ne, %40, %c0_i32_25 : i32
    scf.if %41 {
      %c0_26 = arith.constant 0 : index
      %c0_27 = arith.constant 0 : index
      %42 = vector.load %arg7[%c0_26, %c0_27] : memref<16x1xf32, #tpu.memory_space<vmem>>, vector<16x1xf32>
      %c0_28 = arith.constant 0 : index
      %c0_29 = arith.constant 0 : index
      %43 = vector.load %arg8[%c0_28, %c0_29] : memref<16x1xf32, #tpu.memory_space<vmem>>, vector<16x1xf32>
      %44 = math.log %43 : vector<16x1xf32>
      %45 = arith.addf %42, %44 : vector<16x1xf32>
      %c0_30 = arith.constant 0 : index
      %c0_31 = arith.constant 0 : index
      %46 = vector.load %arg9[%c0_30, %c0_31] : memref<16x1xf32, #tpu.memory_space<vmem>>, vector<16x1xf32>
      %47 = arith.subf %45, %46 : vector<16x1xf32>
      %c0_32 = arith.constant 0 : index
      %c0_33 = arith.constant 0 : index
      %48 = vector.load %arg6[%c0_32, %c0_33] : memref<16x1xf32, #tpu.memory_space<vmem>>, vector<16x1xf32>
      tpu.vector_store %arg6[%c0_32, %c0_33], %47 {strides = array<i32>} : memref<16x1xf32, #tpu.memory_space<vmem>>, vector<16x1xf32>,
    } else {
    }
    return
  }
  func.func @transform_0(%arg0: i32, %arg1: i32) -> (i32, i32) {
    %c0_i32 = arith.constant 0 : i32
    %c0_i32_0 = arith.constant 0 : i32
    return %arg0, %c0_i32 : i32, i32
  }
  func.func @transform_1(%arg0: i32, %arg1: i32) -> (i32, i32) {
    %c0_i32 = arith.constant 0 : i32
    %c0_i32_0 = arith.constant 0 : i32
    return %c0_i32, %arg1 : i32, i32
  }
  func.func @transform_2(%arg0: i32, %arg1: i32) -> (i32, i32) {
    %c0_i32 = arith.constant 0 : i32
    %c0_i32_0 = arith.constant 0 : i32
    return %c0_i32, %arg1 : i32, i32
  }
  func.func @transform_3(%arg0: i32, %arg1: i32) -> (i32, i32) {
    %c0_i32 = arith.constant 0 : i32
    %c0_i32_0 = arith.constant 0 : i32
    return %arg0, %c0_i32 : i32, i32
  }
  func.func @transform_4(%arg0: i32, %arg1: i32) -> (i32, i32) {
    %c0_i32 = arith.constant 0 : i32
    %c0_i32_0 = arith.constant 0 : i32
    return %arg0, %c0_i32 : i32, i32
  }
}

</mosaic_0001>

<bundles_post_ra>
// kernel: tpu_custom_call.1
= control target key start
LH: loop header
LB: loop body
LE: loop exit
PB: predicated region body
PF: predicated region fallthrough
CT: control target
= control target key end

     0   :  { %9 = vsyncpa [#allocation6], 0  ;;  %s565_s0 = inlined_call_operand.hbm [shape: bf16[16,32], index: 0, kind: input, shape index: {}]   ;;  %s566_s1 = inlined_call_operand.hbm [shape: bf16[32,128], index: 1, kind: input, shape index: {}]   ;;  %s567_s2 = inlined_call_operand.hbm [shape: f32[1,128], index: 2, kind: input, shape index: {}]   ;;  %s568_s3 = inlined_call_operand.hbm [shape: s32[16,1], index: 3, kind: input, shape index: {}]   ;;  %s569_s4 = inlined_call_operand.hbm [shape: f32[16,1], index: 4, kind: output, shape index: {}]  }
   0x1   :  { %10 = vsyncpa [#allocation9], 0 }
   0x2   :  { %11 = vsyncpa [#allocation12], 0 }
   0x3   :  { %12 = vsyncpa [#allocation7], 0  ;;  %s433_s15 = smov [#allocation8]   ;;  %s434_s17 = smov [#allocation5]  }
   0x4   :  { %s30_s16 = sshll.u32 %s433_s15, 4  ;;  %s18_s18 = sshll.u32 %s434_s17, 4  ;;  %s31_s16 = int_to_ptr.vmem [resolvable:$true] %s30_s16  ;;  %s471_s18 = int_to_ptr.vmem [resolvable:$true] %s18_s18 }
   0x5   :  { %s315_s21 = scalar_lea.hbm %s566_s1, 256 }
   0x6   :  { %p316_p0 = scmp.ne.s32.totalorder %s566_s1, %s315_s21  ;;  %p319_p1 = scmp.lt.u32.totalorder %s315_s21, %s566_s1 }
   0x8   :  { %p321_p2 = pnand %p319_p1, %p316_p0 }
   0xa   :  { %324 = shalt.err (!%p321_p2)
}
   0xb   :  { %s325_s26 = scalar_lea.vmem %s31_s16, 256  ;;  %p330_p4 = scmp.lt.s32.totalorder %s31_s16, %s31_s16 }
   0xc   :  { %p326_p3 = scmp.ne.s32.totalorder %s31_s16, %s325_s26  ;;  %p331_p5 = scmp.lt.s32.totalorder %s325_s26, %s325_s26 }
   0xe   :  { %p332_p6 = por %p331_p5, %p330_p4 }
  0x10   :  { %p333_p7 = pnand %p332_p6, %p326_p3 }
  0x12   :  { %336 = shalt.err (!%p333_p7)
}
  0x13   :  { %s435_s27 = smov 64   ;;  %s436_s28 = smov 4  }
  0x14   :  { %36 = dma.hbm_to_vmem [thread:$0]  %s566_s1, 256, %s31_s16, [#allocation9], %s435_s27, %s435_s27, %s436_s28  }
  0x15   :  { %s337_s7 = scalar_lea.hbm %s565_s0, 128 }
  0x16   :  { %p338_p8 = scmp.ne.s32.totalorder %s565_s0, %s337_s7  ;;  %p341_p9 = scmp.lt.u32.totalorder %s337_s7, %s565_s0 }
  0x18   :  { %p343_p10 = pnand %p341_p9, %p338_p8 }
  0x1a   :  { %346 = shalt.err (!%p343_p10)
}
  0x1b   :  { %s347_s12 = scalar_lea.vmem %s471_s18, 128  ;;  %p352_p12 = scmp.lt.s32.totalorder %s471_s18, %s471_s18 }
  0x1c   :  { %p348_p11 = scmp.ne.s32.totalorder %s471_s18, %s347_s12  ;;  %p353_p13 = scmp.lt.s32.totalorder %s347_s12, %s347_s12 }
  0x1e   :  { %p354_p0 = por %p353_p13, %p352_p12 }
  0x20   :  { %p355_p1 = pnand %p354_p0, %p348_p11 }
  0x22   :  { %358 = shalt.err (!%p355_p1)
}
  0x23   :  { %24 = dma.hbm_to_vmem [thread:$0]  %s565_s0, 128, %s471_s18, [#allocation6], %s435_s27, %s435_s27, %s436_s28  }
  0x24   :  { %s437_s14 = smov [#allocation10]   ;;  %s438_s16 = smov [#allocation11]  }
  0x25   :  { %s43_s15 = sshll.u32 %s437_s14, 4  ;;  %s52_s17 = sshll.u32 %s438_s16, 4  ;;  %s44_s15 = int_to_ptr.vmem [resolvable:$true] %s43_s15  ;;  %s502_s17 = int_to_ptr.vmem [resolvable:$true] %s52_s17 }
  0x26   :  { %s359_s21 = scalar_lea.hbm %s567_s2, 16 }
  0x27   :  { %p360_p2 = scmp.ne.s32.totalorder %s567_s2, %s359_s21  ;;  %p363_p3 = scmp.lt.u32.totalorder %s359_s21, %s567_s2 }
  0x29   :  { %p365_p4 = pnand %p363_p3, %p360_p2 }
  0x2b   :  { %368 = shalt.err (!%p365_p4)
}
  0x2c   :  { %s369_s0 = scalar_lea.vmem %s44_s15, 16  ;;  %s373_s18 = scalar_lea.vmem %s44_s15, 32 }
  0x2d   :  { %p370_p5 = scmp.ne.s32.totalorder %s44_s15, %s369_s0  ;;  %p374_p6 = scmp.lt.s32.totalorder %s44_s15, %s44_s15 }
  0x2e   :  { %p375_p7 = scmp.lt.s32.totalorder %s373_s18, %s369_s0 }
  0x30   :  { %p376_p8 = por %p375_p7, %p374_p6 }
  0x32   :  { %p377_p9 = pnand %p376_p8, %p370_p5 }
  0x34   :  { %380 = shalt.err (!%p377_p9)
}
  0x35   :  { %46 = dma.hbm_to_vmem [thread:$0]  %s567_s2, 16, %s44_s15, [#allocation9]  }
  0x36   :  { %s381_s30 = scalar_lea.hbm %s568_s3, 256 }
  0x37   :  { %p382_p10 = scmp.ne.s32.totalorder %s568_s3, %s381_s30  ;;  %p385_p11 = scmp.lt.u32.totalorder %s381_s30, %s568_s3 }
  0x39   :  { %p387_p12 = pnand %p385_p11, %p382_p10 }
  0x3b   :  { %390 = shalt.err (!%p387_p12)
}
  0x3c   :  { %s391_s9 = scalar_lea.vmem %s502_s17, 256  ;;  %p396_p0 = scmp.lt.s32.totalorder %s502_s17, %s502_s17 }
  0x3d   :  { %p392_p13 = scmp.ne.s32.totalorder %s502_s17, %s391_s9  ;;  %p397_p1 = scmp.lt.s32.totalorder %s391_s9, %s391_s9 }
  0x3f   :  { %p398_p2 = por %p397_p1, %p396_p0 }
  0x41   :  { %p399_p3 = pnand %p398_p2, %p392_p13 }
  0x43   :  { %402 = shalt.err (!%p399_p3)
}
  0x44   :  { %s439_s2 = smov 128   ;;  %s440_s10 = smov 8  }
  0x45   :  { %58 = dma.hbm_to_vmem [thread:$0]  %s568_s3, 256, %s502_s17, [#allocation12], %s439_s2, %s439_s2, %s440_s10  }
  0x46   :  { %425 = dma.done.wait [#allocation6], 128  }
  0x47   :  { %426 = vsyncadd [#allocation6], 4294967168 }
  0x48   :  { %427 = dma.done.wait [#allocation9], 272  }
  0x49   :  { %428 = vsyncadd [#allocation9], 4294967024 }
  0x4a   :  { %429 = dma.done.wait [#allocation12], 256  }
  0x4b   :  { %430 = vsyncadd [#allocation12], 4294967040  ;;  %v441_v0 = vmov 0.0   ;;  %vm442_vm0 = vmmov 0   ;;  %v300_v1 = vld [vmem:[#allocation8] sm:$0xff]   ;;  %v301_v2 = vld [vmem:[#allocation8 + $0x8] sm:$0xff]   ;;  %v209_v21 = vlaneseq }
  0x4c   :  { %277 = vmatprep.subr.bf16.mxu0 %v441_v0  ;;  %281 = vmatprep.mubr.msk.bf16.mxu0 %vm442_vm0, %v441_v0  ;;  %v302_v3 = vld [vmem:[#allocation5] sm:$0xff]   ;;  %vm113_vm1 = vcmask 261120   ;;  %v443_v4 = vmov 0   ;;  %vm76_vm2 = vcmask 7168   ;;  %v444_v5 = vmov -inf   ;;  %s445_s3 = smov [#allocation13]  }
  0x4d   :  { %278 = vmatpush3.bf16.msra.mxu0 %v300_v1  ;;  %299 = vset.pattern.permute.xlu0 %v443_v4  ;;  %77 = vst.msk [vmem:[#allocation2] sm:$0xff] %vm76_vm2, %v444_v5  ;;  %78 = vst.msk [vmem:[#allocation2 + $0x8] sm:$0xff] %vm76_vm2, %v444_v5  ;;  %v269_v6 = vld [vmem:[#allocation10] ss:$0 sm:$0xff]  ;;  %v203_v13 = vld [vmem:[#allocation11] sm:$0xff]  ;;  %v210_v24 = vand.u32 127, %v209_v21 }
  0x4e   :  { %279 = vmatprep.subr.bf16.mxu0 %v441_v0  ;;  %298 = vset.pattern.permute.xlu1 %v443_v4  ;;  %79 = vst.msk [vmem:[#allocation3] sm:$0xff] %vm76_vm2, %v441_v0  ;;  %80 = vst.msk [vmem:[#allocation3 + $0x8] sm:$0xff] %vm76_vm2, %v441_v0  ;;  %v204_v23 = vld [vmem:[#allocation11 + $0x8] sm:$0xff]  ;;  %s255_s1 = sshll.u32 %s445_s3, 4  ;;  %s256_s1 = int_to_ptr.vmem [resolvable:$true] %s255_s1 }
  0x4f   :  { %81 = vst.msk [vmem:[#allocation4] sm:$0xff] %vm76_vm2, %v441_v0  ;;  %82 = vst.msk [vmem:[#allocation4 + $0x8] sm:$0xff] %vm76_vm2, %v441_v0  ;;  %s403_s13 = scalar_lea.vmem %s256_s1, 256  ;;  %p408_p5 = scmp.lt.s32.totalorder %s256_s1, %s256_s1 }
  0x50   :  { %p404_p4 = scmp.ne.s32.totalorder %s256_s1, %s403_s13  ;;  %p409_p6 = scmp.lt.s32.totalorder %s403_s13, %s403_s13 }
  0x51   :  { %280 = vmatpush3.bf16.msra.mxu0 %v301_v2 }
  0x52   :  { %p410_p7 = por %p409_p6, %p408_p5 }
  0x54   :  { %282 = vmatmul.mubr.msk.bf16.vlgmr.msra.gmra.mrb[0].mxu0 %vm113_vm1, %v302_v3  ;;  %v158_v14 = vld [vmem:[#allocation2] sm:$0xff]  ;;  %v159_v17 = vld [vmem:[#allocation2 + $0x8] sm:$0xff]  ;;  %p411_p8 = pnand %p410_p7, %p404_p4 }
  0x55   :  { %v188_v43 = vld [vmem:[#allocation3] sm:$0xff]  ;;  %v189_v47 = vld [vmem:[#allocation3 + $0x8] sm:$0xff] }
  0x56   :  { %v211_v37 = vld [vmem:[#allocation4] sm:$0xff]  ;;  %v212_v52 = vld [vmem:[#allocation4 + $0x8] sm:$0xff] }
 0x127   :  { %v151_v7 = vpop.f32.mrb[0].mxu0 }
 0x128   :  { %v152_v8 = vadd.f32 %v269_v6, %v151_v7  ;;  %v283_v9 = vpop.f32.mrb[1].mxu0 }
 0x129   :  { %v154_v10 = vpop.f32.mrb[2].mxu0 }
 0x12a   :  { %160 = vmax.xlane.f32.xlu0 %v152_v8  ;;  %v284_v11 = vpop.f32.mrb[3].mxu0  ;;  %v155_v12 = vadd.f32 %v269_v6, %v154_v10 }
 0x12e   :  { %162 = vmax.xlane.f32.xlu0 %v155_v12 }
 0x144   :  { %214 = vperm.xlu0 %299, %v203_v13  }
 0x1b7   :  { %v161_v15 = vpop.xlane.xlu0 %160 }
 0x1b8   :  { %v164_v16 = vmax.f32 %v158_v14, %v161_v15 }
 0x1ba   :  { %v166_v18 = vsub.f32 %v158_v14, %v164_v16  ;;  %201 = vst.msk [vmem:[#allocation2] sm:$0xff] %vm76_vm2, %v164_v16  ;;  %174 = vperm.xlu1 %298, %v164_v16  }
 0x1bb   :  { %v163_v19 = vpop.xlane.xlu0 %162 }
 0x1bc   :  { %v165_v20 = vmax.f32 %v159_v17, %v163_v19  ;;  %v168_v40 = vmul.f32 1.442695, %v166_v18 }
 0x1be   :  { %v167_v22 = vsub.f32 %v159_v17, %v165_v20  ;;  %202 = vst.msk [vmem:[#allocation2 + $0x8] sm:$0xff] %vm76_vm2, %v165_v20  ;;  %179 = vperm.xlu1 %298, %v165_v20  }
 0x1c0   :  { %v170_v41 = vmul.f32 1.442695, %v167_v22 }
 0x1c1   :  { %v234_v59 = vld [vmem:[#allocation2] sm:$0xff] }
 0x1c2   :  { %217 = vperm.xlu1 %298, %v204_v23  }
 0x1c3   :  { %v215_v25 = vpop.permute.xlu0 %214 }
 0x1c4   :  { %vm219_vm3 = vcmp.eq.s32.totalorder %v210_v24, %v215_v25 }
 0x1c5   :  { %v221_v26 = vsel %vm219_vm3, %v152_v8, 0.0  ;;  %v235_v1 = vld [vmem:[#allocation2 + $0x8] sm:$0xff] }
 0x1c6   :  { %223 = vadd.xlane.f32.xlu0 %v221_v26 }
 0x239   :  { %v175_v27 = vpop.permute.xlu1 %174 }
 0x23a   :  { %v182_v28 = vsub.f32 %v152_v8, %v175_v27 }
 0x23c   :  { %v184_v29 = vmul.f32 1.442695, %v182_v28 }
 0x23d   :  { %v180_v30 = vpop.permute.xlu1 %179 }
 0x23e   :  { %303 = vpow2.f32 %v184_v29  ;;  %v183_v31 = vsub.f32 %v155_v12, %v180_v30 }
 0x240   :  { %v186_v32 = vmul.f32 1.442695, %v183_v31 }
 0x241   :  { %v218_v34 = vpop.permute.xlu1 %217 }
 0x242   :  { %305 = vpow2.f32 %v186_v32  ;;  %vm220_vm4 = vcmp.eq.s32.totalorder %v210_v24, %v218_v34 }
 0x243   :  { %v222_v36 = vsel %vm220_vm4, %v155_v12, 0.0  ;;  %307 = vpow2.f32 %v168_v40 }
 0x244   :  { %309 = vpow2.f32 %v170_v41 }
 0x248   :  { %v304_v33 = vpop.eup %303 }
 0x249   :  { %192 = vadd.xlane.f32.xlu1 %v304_v33 }
 0x24c   :  { %v306_v35 = vpop.eup %305 }
 0x24d   :  { %194 = vadd.xlane.f32.xlu1 %v306_v35  ;;  %v308_v42 = vpop.eup %307 }
 0x24e   :  { %v190_v44 = vmul.f32 %v308_v42, %v188_v43  ;;  %v310_v45 = vpop.eup %309 }
 0x24f   :  { %v191_v49 = vmul.f32 %v310_v45, %v189_v47 }
 0x251   :  { %225 = vadd.xlane.f32.xlu1 %v222_v36 }
 0x253   :  { %v224_v38 = vpop.xlane.xlu0 %223 }
 0x254   :  { %v227_v39 = vadd.f32 %v224_v38, %v211_v37 }
 0x256   :  { %229 = vst.msk [vmem:[#allocation4] sm:$0xff] %vm76_vm2, %v227_v39 }
 0x25d   :  { %v244_v62 = vld [vmem:[#allocation4] sm:$0xff] }
 0x2d6   :  { %v193_v46 = vpop.xlane.xlu1 %192 }
 0x2d7   :  { %v196_v48 = vadd.f32 %v193_v46, %v190_v44 }
 0x2d9   :  { %199 = vst.msk [vmem:[#allocation3] sm:$0xff] %vm76_vm2, %v196_v48 }
 0x2da   :  { %v195_v50 = vpop.xlane.xlu1 %194 }
 0x2db   :  { %v197_v51 = vadd.f32 %v195_v50, %v191_v49 }
 0x2dd   :  { %200 = vst.msk [vmem:[#allocation3 + $0x8] sm:$0xff] %vm76_vm2, %v197_v51 }
 0x2de   :  { %v226_v53 = vpop.xlane.xlu1 %225 }
 0x2df   :  { %v228_v54 = vadd.f32 %v226_v53, %v212_v52 }
 0x2e0   :  { %v236_v55 = vld [vmem:[#allocation3] sm:$0xff] }
 0x2e1   :  { %230 = vst.msk [vmem:[#allocation4 + $0x8] sm:$0xff] %vm76_vm2, %v228_v54  ;;  %311 = vlog2.f32 %v236_v55 }
 0x2e4   :  { %v237_v56 = vld [vmem:[#allocation3 + $0x8] sm:$0xff] }
 0x2e5   :  { %313 = vlog2.f32 %v237_v56 }
 0x2e8   :  { %v245_v3 = vld [vmem:[#allocation4 + $0x8] sm:$0xff] }
 0x2eb   :  { %v312_v57 = vpop.eup %311 }
 0x2ec   :  { %v239_v58 = vmul.f32 0.6931472, %v312_v57 }
 0x2ee   :  { %v242_v60 = vadd.f32 %v239_v58, %v234_v59 }
 0x2ef   :  { %v314_v61 = vpop.eup %313 }
 0x2f0   :  { %v241_v63 = vmul.f32 0.6931472, %v314_v61  ;;  %v246_v0 = vsub.f32 %v242_v60, %v244_v62 }
 0x2f2   :  { %v243_v2 = vadd.f32 %v241_v63, %v235_v1  ;;  %248 = vst.msk [vmem:[#allocation13] sm:$0xff] %vm76_vm2, %v246_v0 }
 0x2f4   :  { %v247_v4 = vsub.f32 %v243_v2, %v245_v3 }
 0x2f6   :  { %249 = vst.msk [vmem:[#allocation13 + $0x8] sm:$0xff] %vm76_vm2, %v247_v4 }
 0x2f7   :  { %414 = shalt.err (!%p411_p8)
}
 0x2f8   :  { %s415_s16 = scalar_lea.hbm %s569_s4, 256 }
 0x2f9   :  { %p416_p9 = scmp.ne.s32.totalorder %s569_s4, %s415_s16  ;;  %p419_p10 = scmp.lt.u32.totalorder %s415_s16, %s569_s4 }
 0x2fb   :  { %p421_p11 = pnand %p419_p10, %p416_p9 }
 0x2fd   :  { %424 = shalt.err (!%p421_p11)
}
 0x2fe   :  { %261 = dma.vmem_to_hbm [thread:$0]  %s256_s1, 256, %s569_s4, [#allocation7], %s439_s2, %s439_s2, %s440_s10  }
 0x2ff   :  { %431 = dma.done.wait [#allocation7], 256  }
 0x300   :  { %432 = vsyncadd [#allocation7], 4294967040 }
 0x301   :  { %265 = vsyncpa [#allocation6], 1 }
 0x302   :  { %266 = vsyncpa [#allocation9], 1 }
 0x303   :  { %267 = vsyncpa [#allocation12], 1 }
 0x304   :  { %268 = vsyncpa [#allocation7], 1 }

</bundles_post_ra>
